<compile_context>
chip_gen: v7x
topology: tpu7x:2x2x1
jax: 0.10.0
libtpu: 0.0.40
codegen_flags: <defaults>
</compile_context>

<pallas_src>
import functools
import numpy as np
import jax
import jax.numpy as jnp
from jax import lax
from jax.experimental import pallas as pl
from jax.experimental.pallas import tpu as pltpu

_NEG = -1e30   # finite "-inf": exp() underflows to exactly 0 in f32


@functools.lru_cache(maxsize=1)
def _vmem_limit_bytes():
    """Generation-aware scoped-VMEM limit: ~3/4 of physical capacity
    (96 MiB on v5e/v6e's 128 MiB, 48 MiB on v7x's 64 MiB); safe fallback."""
    cap = None
    try:
        cap = getattr(pltpu.get_tpu_info(), "vmem_capacity_bytes", None)
    except Exception:
        cap = None
    if not cap or cap <= 0:
        cap = 64 * 1024 * 1024              # assume v7x-sized VMEM if query fails
    return int(min(cap * 3 // 4, 100 * 1024 * 1024))


# ----------------------------------------------------------------------------
# Linear projection kernels (row-tiled, weights resident, optional f32 bias)
# ----------------------------------------------------------------------------
def _linear_kernel(x_ref, w_ref, o_ref):
    x = x_ref[...].astype(w_ref.dtype)       # cast activations in-kernel (no HBM pass)
    o_ref[...] = jnp.dot(x, w_ref[...],
                         preferred_element_type=jnp.float32).astype(o_ref.dtype)


def _linear_bias_kernel(x_ref, w_ref, b_ref, o_ref):
    x = x_ref[...].astype(w_ref.dtype)
    acc = jnp.dot(x, w_ref[...], preferred_element_type=jnp.float32)
    o_ref[...] = (acc + b_ref[...]).astype(o_ref.dtype)


def _pick_row_tile(m, row_tile):
    cap = min(row_tile, m)
    if m >= 16:                 # keep >=2 row tiles so both v7x TensorCores get work
        cap = min(cap, (m + 1) // 2)
    for cand in range(cap, 0, -1):
        if m % cand == 0 and (cand % 8 == 0 or cand == m):
            return cand
    return m                    # fallback: single full block


def linear_pallas(x2d, w, b=None, *, out_dtype=jnp.float32, row_tile=1024):
    """y = x2d @ w (+ b).  x2d: (M, K); w: (K, Kout) already in compute dtype;
    b: (Kout,) f32 or None.  f32 MXU accumulation."""
    M, K = x2d.shape
    Kout = w.shape[1]
    tm = _pick_row_tile(M, row_tile)
    grid = (pl.cdiv(M, tm),)
    in_specs = [pl.BlockSpec((tm, K), lambda i: (i, 0)),
                pl.BlockSpec((K, Kout), lambda i: (0, 0))]   # constant -> DMA'd once
    args = [x2d, w]
    if b is None:
        kern = _linear_kernel
    else:
        kern = _linear_bias_kernel
        in_specs.append(pl.BlockSpec((1, Kout), lambda i: (0, 0)))
        args.append(b.reshape(1, Kout).astype(jnp.float32))
    return pl.pallas_call(
        kern,
        out_shape=jax.ShapeDtypeStruct((M, Kout), out_dtype),
        grid=grid,
        in_specs=in_specs,
        out_specs=pl.BlockSpec((tm, Kout), lambda i: (i, 0)),
        compiler_params=pltpu.CompilerParams(
            dimension_semantics=("parallel",),
            vmem_limit_bytes=_vmem_limit_bytes()),
    )(*args)


# ----------------------------------------------------------------------------
# Window attention kernel: all heads + a tile of windows per grid step
# ----------------------------------------------------------------------------
def _window_attn_kernel(*refs, num_heads, head_dim, embed_dim, masked):
    # Block shapes: qkv (W_TILE, N, 3C), pos (N, N) f32, codes (W_TILE, 2, N) f32,
    # out (W_TILE, N, C), bias scratch (W_TILE, N, N) f32 (masked only).
    if masked:
        qkv_ref, pos_ref, codes_ref, o_ref, bias_ref = refs

        # Build (rel-pos + shift mask) bias ONCE per window tile; the batch grid
        # axis is innermost and "arbitrary", so the scratch is reused for all B.
        @pl.when(pl.program_id(1) == 0)
        def _build_bias():
            codes = codes_ref[...]                                  # (W_TILE, 2, N)
            cx = codes[:, 0, :]
            cy = codes[:, 1, :]
            shift = (jnp.abs(cx[:, :, None] - cx[:, None, :]) +
                     jnp.abs(cy[:, :, None] - cy[:, None, :])) * _NEG
            bias_ref[...] = pos_ref[...] + shift                    # (W_TILE, N, N) f32
    else:
        qkv_ref, pos_ref, o_ref = refs

    C = embed_dim
    dn_qk = (((2,), (2,)), ((0,), (0,)))   # contract head_dim, batch over windows
    dn_pv = (((2,), (1,)), ((0,), (0,)))
    for h in range(num_heads):             # small static unroll over heads
        lo = h * head_dim
        # Per-head ref slices: loads stream per head instead of keeping full
        # (W_TILE,N,3C) values live across the unrolled loop.
        qh = qkv_ref[:, :, lo:lo + head_dim]
        kh = qkv_ref[:, :, C + lo:C + lo + head_dim]
        vh = qkv_ref[:, :, 2 * C + lo:2 * C + lo + head_dim]
        # NOTE: softmax scale is folded into the q columns of qkv_w at init.
        s = lax.dot_general(qh, kh, dn_qk, preferred_element_type=jnp.float32)
        if masked:
            s = s + bias_ref[...]
        else:
            s = s + pos_ref[...]
        m = jnp.max(s, axis=-1, keepdims=True)
        p = jnp.exp(s - m)
        p = p * pl.reciprocal(jnp.sum(p, axis=-1, keepdims=True), approx=True)
        o_h = lax.dot_general(p.astype(vh.dtype), vh, dn_pv,
                              preferred_element_type=jnp.float32)
        o_ref[:, :, lo:lo + head_dim] = o_h.astype(o_ref.dtype)   # per-head store


def _pick_window_tile(nw, n, c, itemsize, budget, *, min_tiles=2):
    """Largest divisor-of-NW tile whose VMEM footprint fits the budget, capped
    so that >= min_tiles window tiles exist (v7x shards the parallel window
    axis across its 2 TensorCores)."""
    cap = max(1, nw // min_tiles) if nw >= min_tiles else nw
    cands = [d for d in range(1, nw + 1) if nw % d == 0 and d <= cap] or [1]

    def est(d):
        io = 2 * d * n * (3 * c + c) * itemsize   # double-buffered qkv-in + out blocks
        bias = d * n * n * 4                      # f32 bias scratch
        tmps = 3 * d * n * n * 4                  # f32 score/prob temporaries headroom
        return io + bias + tmps + (1 << 20)       # + compiler-internal scratch

    fits = [d for d in cands if est(d) <= budget]
    return max(fits) if fits else min(cands)


def window_attention_pallas(qkv, pos, codes, *, num_heads, masked, w_tile, out_dtype):
    # qkv: (B, NW, N, 3C);  pos: (N, N) f32;  codes: (NW, 2, N) f32 (only if masked)
    B, NW, N, C3 = qkv.shape
    C = C3 // 3
    assert NW % w_tile == 0
    # window tiles outer (parallel, sharded on v7x), batch inner (arbitrary:
    # the bias scratch is carried across it).
    grid = (NW // w_tile, B)
    in_specs = [pl.BlockSpec((None, w_tile, N, C3), lambda w, b: (b, w, 0, 0)),
                pl.BlockSpec((N, N), lambda w, b: (0, 0))]
    args = [qkv, pos]
    scratch = []
    if masked:
        in_specs.append(pl.BlockSpec((w_tile, 2, N), lambda w, b: (w, 0, 0)))
        args.append(codes)
        scratch.append(pltpu.VMEM((w_tile, N, N), jnp.float32))
    kern = functools.partial(_window_attn_kernel, num_heads=num_heads,
                             head_dim=C // num_heads, embed_dim=C, masked=masked)
    return pl.pallas_call(
        kern,
        out_shape=jax.ShapeDtypeStruct((B, NW, N, C), out_dtype),
        grid=grid,
        in_specs=in_specs,
        out_specs=pl.BlockSpec((None, w_tile, N, C), lambda w, b: (b, w, 0, 0)),
        scratch_shapes=scratch,
        compiler_params=pltpu.CompilerParams(
            dimension_semantics=("parallel", "arbitrary"),
            vmem_limit_bytes=_vmem_limit_bytes()),
    )(*args)


# ----------------------------------------------------------------------------
# Static helpers (numpy) — replicate the PyTorch helpers exactly
# ----------------------------------------------------------------------------
def create_mask(window_size, displacement, top_bottom, upper_lower, left_right):
    # NOTE: faithfully replicates the original module, including top_bottom
    # masking the same (x) window axis as left_right.
    ws, d = window_size, displacement
    m = np.zeros((ws, ws, ws, ws, ws, ws), dtype=np.float32)
    if top_bottom:
        m[:, :, -d:, :, :, :-d] = -np.inf
        m[:, :, :-d, :, :, -d:] = -np.inf
    elif upper_lower:
        m[:, -d:, :, :, :-d, :] = -np.inf
        m[:, :-d, :, :, -d:, :] = -np.inf
    elif left_right:
        m[:, :, -d:, :, :, :-d] = -np.inf
        m[:, :, :-d, :, :, -d:] = -np.inf
    return m.reshape(ws ** 3, ws ** 3)


def get_relative_indices(window_size):
    ws = window_size
    idx = np.array(
        [[z, y, x] for z in range(ws) for y in range(ws) for x in range(ws)],
        dtype=np.int32)
    rel = idx[None, :, :] - idx[:, None, :]     # (N, N, 3)
    return rel + ws - 1


# ----------------------------------------------------------------------------
# WindowMSA in JAX with Pallas hot paths
# ----------------------------------------------------------------------------
class WindowMSA:
    def __init__(self, embed_dim, num_heads, window_size, shifted,
                 rel_pos_embed=True, key=None, compute_dtype=jnp.bfloat16):
        self.embed_dim = embed_dim
        self.num_heads = num_heads
        self.head_dim = embed_dim // num_heads
        self.scale = self.head_dim ** (-0.5)
        self.window_size = window_size
        self.shifted = shifted
        self.rel_pos_embed = rel_pos_embed
        self.compute_dtype = compute_dtype

        k0, k1, k2, k3 = jax.random.split(key, 4)
        # Weights stored pre-transposed (in_features, out_features).
        self.qkv_w = jax.random.normal(k0, (embed_dim, 3 * embed_dim), jnp.float32) * 0.05
        self.proj_w = jax.random.normal(k1, (embed_dim, embed_dim), jnp.float32) * 0.05
        self.proj_b = jax.random.normal(k2, (embed_dim,), jnp.float32) * 0.05
        # Fold the softmax scale into the q columns: removes per-head score
        # scaling from the attention kernel at zero runtime cost.
        self._qkv_w_scaled = self.qkv_w.at[:, :embed_dim].multiply(self.scale)

        ws = window_size
        N = ws ** 3
        if rel_pos_embed:
            self.relative_indices = get_relative_indices(ws)              # (N, N, 3)
            self.pos_embed = jax.random.normal(
                k3, (2 * ws - 1, 2 * ws - 1, 2 * ws - 1), jnp.float32)
        else:
            self.pos_embed = jax.random.normal(k3, (N, N), jnp.float32)

        if shifted:
            self.displacement = ws // 2
            self.top_bottom_mask = create_mask(ws, self.displacement, True, False, False)
            self.upper_lower_mask = create_mask(ws, self.displacement, False, True, False)
            self.left_right_mask = create_mask(ws, self.displacement, False, False, True)

        self._codes_cache = {}

    # ---- bias helpers ------------------------------------------------------
    def _pos_bias(self):
        if self.rel_pos_embed:
            ri = self.relative_indices
            return self.pos_embed[ri[..., 0], ri[..., 1], ri[..., 2]]      # (N, N)
        return self.pos_embed

    def _shift_codes(self, nwz, nwy, nwx):
        """Per-window/per-token region codes packed as (NW, 2, N). In-kernel,
        mask[i,j] = -1e30 * (|cx_i-cx_j| + |cy_i-cy_j|) reproduces the original
        top_bottom / upper_lower / left_right -inf masks (softmax-identical)."""
        key_ = (nwz, nwy, nwx)
        if key_ in self._codes_cache:
            return self._codes_cache[key_]
        ws = self.window_size
        N, NW = ws ** 3, nwz * nwy * nwx
        codes = np.zeros((NW, 2, N), np.float32)
        d = self.displacement
        tok = np.arange(N)
        xr = ((tok % ws) >= (ws - d)).astype(np.float32)
        yr = (((tok // ws) % ws) >= (ws - d)).astype(np.float32)
        for w in range(NW):
            iz = w // (nwy * nwx)
            iy = (w // nwx) % nwy
            ix = w % nwx
            if iz == nwz - 1 or ix == nwx - 1:   # top_bottom / left_right (x-type)
                codes[w, 0] = xr
            if iy == nwy - 1:                    # upper_lower (y-type)
                codes[w, 1] = yr
        codes = jnp.asarray(codes)
        self._codes_cache[key_] = codes
        return codes

    def _window_bias(self, nwz, nwy, nwx):
        """Reference-path additive bias (NW, N, N): rel-pos + -inf shift masks."""
        N = self.window_size ** 3
        pos = np.asarray(self._pos_bias(), dtype=np.float32)
        bias = np.broadcast_to(pos, (nwz, nwy, nwx, N, N)).copy()
        if self.shifted:
            bias[-1, :, :] += self.top_bottom_mask
            bias[:, -1, :] += self.upper_lower_mask
            bias[:, :, -1] += self.left_right_mask
        return jnp.asarray(bias.reshape(nwz * nwy * nwx, N, N))

    # ---- forward (Pallas) --------------------------------------------------
    def __call__(self, x, compute_dtype=None):
        cd = self.compute_dtype if compute_dtype is None else compute_dtype
        ws, H, C = self.window_size, self.num_heads, self.embed_dim
        if self.shifted:
            d = self.displacement
            x = jnp.roll(x, shift=(-d, -d, -d), axis=(1, 2, 3))
        B, Z, Y, X, _ = x.shape
        nwz, nwy, nwx = Z // ws, Y // ws, X // ws
        NW, N = nwz * nwy * nwx, ws ** 3

        # Weights cast once outside the kernels (no per-grid-step weight cast).
        qkv_w = self._qkv_w_scaled.astype(cd)
        proj_w = self.proj_w.astype(cd)

        # qkv projection (no bias); compute-dtype output halves windowing traffic.
        qkv = linear_pallas(x.reshape(B * Z * Y * X, C), qkv_w, out_dtype=cd)

        # Window rearrangement, keeping the fused channel dim (3C) minor.
        qkv = qkv.reshape(B, nwz, ws, nwy, ws, nwx, ws, 3 * C)
        qkv = qkv.transpose(0, 1, 3, 5, 2, 4, 6, 7).reshape(B, NW, N, 3 * C)
        # TODO(synk): fold the window (de)rearrangement into the attention/proj
        # BlockSpec index_maps; (1, ws, ws, ws, C) sub-blocks violate the (8,128)
        # block rule at small window sizes, so the transposes stay in XLA (cd dtype).

        pos = self._pos_bias().astype(jnp.float32)                  # (N, N)
        codes = self._shift_codes(nwz, nwy, nwx) if self.shifted else None
        w_tile = _pick_window_tile(NW, N, C, np.dtype(cd).itemsize,
                                   budget=_vmem_limit_bytes() // 2)
        out = window_attention_pallas(qkv, pos, codes, num_heads=H,
                                      masked=self.shifted, w_tile=w_tile,
                                      out_dtype=cd)

        # Merge windows back (channel dim stays minor).
        out = out.reshape(B, nwz, nwy, nwx, ws, ws, ws, C)
        out = out.transpose(0, 1, 4, 2, 5, 3, 6, 7).reshape(B * Z * Y * X, C)

        out = linear_pallas(out, proj_w, self.proj_b, out_dtype=jnp.float32)
        out = out.reshape(B, Z, Y, X, C)
        if self.shifted:
            d = self.displacement
            out = jnp.roll(out, shift=(d, d, d), axis=(1, 2, 3))
        return out

    # ---- pure-JAX f32 reference (mirrors the PyTorch forward) ---------------
    def reference(self, x):
        ws, H, Dh = self.window_size, self.num_heads, self.head_dim
        if self.shifted:
            d = self.displacement
            x = jnp.roll(x, shift=(-d, -d, -d), axis=(1, 2, 3))
        B, Z, Y, X, C = x.shape
        nwz, nwy, nwx = Z // ws, Y // ws, X // ws
        NW, N = nwz * nwy * nwx, ws ** 3

        qkv = x @ self.qkv_w
        q_lin, k_lin, v_lin = jnp.split(qkv, 3, axis=-1)

        def to_windows(t):
            t = t.reshape(B, nwz, ws, nwy, ws, nwx, ws, H, Dh)
            t = t.transpose(0, 7, 1, 3, 5, 2, 4, 6, 8)
            return t.reshape(B, H, NW, N, Dh)

        q, k, v = map(to_windows, (q_lin, k_lin, v_lin))
        dots = jnp.einsum('bhwid,bhwjd->bhwij', q, k) * self.scale
        dots = dots + self._window_bias(nwz, nwy, nwx)[None, None]
        attn = jax.nn.softmax(dots, axis=-1)
        out = jnp.einsum('bhwij,bhwjd->bhwid', attn, v)
        out = out.reshape(B, H, nwz, nwy, nwx, ws, ws, ws, Dh)
        out = out.transpose(0, 2, 5, 3, 6, 4, 7, 1, 8).reshape(B, Z, Y, X, C)
        out = out @ self.proj_w + self.proj_b
        if self.shifted:
            d = self.displacement
            out = jnp.roll(out, shift=(d, d, d), axis=(1, 2, 3))
        return out


# ----------------------------------------------------------------------------
if __name__ == "__main__":
    embed_dim = 32
    num_heads = 4
    window_size = 4
    B, Z, Y, X = 2, 8, 8, 8      # 2x2x2 = 8 windows of 4**3 = 64 tokens each

    key = jax.random.PRNGKey(0)
    k_x, k_params = jax.random.split(key)
    x = jax.random.normal(k_x, (B, Z, Y, X, embed_dim), jnp.float32)

    msa = WindowMSA(embed_dim=embed_dim, num_heads=num_heads,
                    window_size=window_size, shifted=True,
                    rel_pos_embed=True, key=k_params)
    ref = jax.block_until_ready(msa.reference(x))

    # f32 compute path: tight check against the pure-JAX reference.
    out_f32 = jax.block_until_ready(msa(x, compute_dtype=jnp.float32))
    np.testing.assert_allclose(np.asarray(out_f32), np.asarray(ref),
                               rtol=2e-3, atol=2e-3)

    # bf16 MXU path (default): f32 accumulation, looser check.
    out_bf16 = jax.block_until_ready(msa(x))
    np.testing.assert_allclose(np.asarray(out_bf16), np.asarray(ref),
                               rtol=5e-2, atol=5e-2)

    # Non-shifted path (no shift-mask codes, no bias scratch).
    msa_ns = WindowMSA(embed_dim=embed_dim, num_heads=num_heads,
                       window_size=window_size, shifted=False,
                       rel_pos_embed=True, key=k_params)
    out_ns = jax.block_until_ready(msa_ns(x, compute_dtype=jnp.float32))
    np.testing.assert_allclose(np.asarray(out_ns),
                               np.asarray(jax.block_until_ready(msa_ns.reference(x))),
                               rtol=2e-3, atol=2e-3)

    assert out_f32.shape == (B, Z, Y, X, embed_dim)
    print("KERNEL_OK")
</pallas_src>

<mosaic_0001>
module attributes {stable_mosaic.version = 11 : i64} {
  func.func @_linear_kernel(%arg0: i32, %arg1: memref<512x32xf32, #tpu.memory_space<vmem>>, %arg2: memref<32x96xf32, #tpu.memory_space<vmem>>, %arg3: memref<512x96xf32, #tpu.memory_space<vmem>>) attributes {dimension_semantics = [#tpu.dimension_semantics<parallel>], iteration_bounds = array<i64: 2>, scalar_prefetch = 0 : i64, scratch_operands = 0 : i64, tpu.core_type = #tpu.core_type<tc>, window_params = [{transform_indices = @transform_0, window_bounds = array<i64: 512, 32>}, {pipeline_mode = #tpu.pipeline_mode<synchronous>, transform_indices = @transform_1, window_bounds = array<i64: 32, 96>}, {transform_indices = @transform_2, window_bounds = array<i64: 512, 96>}]} {
    %c0 = arith.constant 0 : index
    %c0_0 = arith.constant 0 : index
    %0 = vector.load %arg1[%c0, %c0_0] : memref<512x32xf32, #tpu.memory_space<vmem>>, vector<512x32xf32>
    %c0_1 = arith.constant 0 : index
    %c0_2 = arith.constant 0 : index
    %1 = vector.load %arg2[%c0_1, %c0_2] : memref<32x96xf32, #tpu.memory_space<vmem>>, vector<32x96xf32>
    %cst = arith.constant dense<0.000000e+00> : vector<512x96xf32>
    %2 = tpu.matmul %0, %1, %cst {dimension_numbers = #tpu.dot_dimension_numbers<[1], [0], [0], [1], [0, 0, 1, 1], [], []>} : vector<512x32xf32>, vector<32x96xf32>, vector<512x96xf32> -> vector<512x96xf32>
    %c0_3 = arith.constant 0 : index
    %c0_4 = arith.constant 0 : index
    %3 = vector.load %arg3[%c0_3, %c0_4] : memref<512x96xf32, #tpu.memory_space<vmem>>, vector<512x96xf32>
    tpu.vector_store %arg3[%c0_3, %c0_4], %2 {strides = array<i32>} : memref<512x96xf32, #tpu.memory_space<vmem>>, vector<512x96xf32>,
    return
  }
  func.func @transform_0(%arg0: i32) -> (i32, i32) {
    %c0_i32 = arith.constant 0 : i32
    %c0_i32_0 = arith.constant 0 : i32
    return %arg0, %c0_i32 : i32, i32
  }
  func.func @transform_1(%arg0: i32) -> (i32, i32) {
    %c0_i32 = arith.constant 0 : i32
    %c0_i32_0 = arith.constant 0 : i32
    %c0_i32_1 = arith.constant 0 : i32
    return %c0_i32, %c0_i32_0 : i32, i32
  }
  func.func @transform_2(%arg0: i32) -> (i32, i32) {
    %c0_i32 = arith.constant 0 : i32
    %c0_i32_0 = arith.constant 0 : i32
    return %arg0, %c0_i32 : i32, i32
  }
}

</mosaic_0001>

<bundles_post_ra>
// kernel: tpu_custom_call.1
= control target key start
LH: loop header
LB: loop body
LE: loop exit
PB: predicated region body
PF: predicated region fallthrough
CT: control target
= control target key end

     0   :  { %s1204_s9 = smov 0   ;;  %s1500_s0 = inlined_call_operand.vmem [shape: f32[1024,32], index: 0, kind: input, shape index: {}]   ;;  %s1501_s1 = inlined_call_operand.vmem [shape: f32[32,96], index: 1, kind: input, shape index: {}]   ;;  %s1502_s2 = inlined_call_operand.vmem [shape: f32[1024,96], index: 2, kind: output, shape index: {}]  }
   0x1 LB: > { %s914_s10 = sadd.s32 4294967295, %s1187_s9   ;;  %p918_p0 = scmp.ge.s32.totalorder %s1187_s9, 1  ;;  %s1187_s9 = sphi %s1204_s9, %s12_s9  }
   0x2   : > { %p113_p1 = scmp.lt.s32.totalorder %s1187_s9, 3 }
   0x4   : > { %p114_p2 = pnand %p918_p0, %p113_p1 }
   0x5   : > { %v211_v0 = vld [vmem:[%s1501_s1] sm:$0xff] (!%p114_p2)  ;;  %v212_v1 = vld [vmem:[%s1501_s1 + $0x8] sm:$0xff] (!%p114_p2)  ;;  %v213_v2 = vld [vmem:[%s1501_s1 + $0x10] sm:$0xff] (!%p114_p2)  ;;  %s919_s17 = sshll.u32 (!%p114_p2), %s914_s10, 6  ;;  %vm215_vm0 = vcmask (!%p114_p2), 261120   ;;  %vm793_vm1 = vcmask (!%p114_p2), 785408  }
   0x6   : > { %117 = sbr.rel (%p114_p2) target bundleno = 293 (0x125), region = 28  ;;  %v1161_v3 = vpack.c.bf16 (!%p114_p2), %v212_v1, %v211_v0  ;;  %v214_v4 = vld [vmem:[%s1501_s1 + $0x18] sm:$0xff] (!%p114_p2)  ;;  %p136_p3 = scmp.lt.s32.totalorder (!%p114_p2), %s919_s17, 127 }
   0x7   : > { %v1165_v5 = vpack.c.bf16 (!%p114_p2), %v214_v4, %v213_v2 }
   0x8   : > { %1162 = vmatprep.subr.bf16.mxu0 (!%p114_p2), %v1161_v3  ;;  %1169 = vmatprep.subr.bf16.mxu1 (!%p114_p2), %v1161_v3 }
   0x9   : > { %1164 = vmatpush3.bf16.msra.mxu0 (!%p114_p2), %v1161_v3  ;;  %1171 = vmatpush3.bf16.msra.mxu1 (!%p114_p2), %v1161_v3 }
   0xa   : > { %1166 = vmatprep.subr.bf16.mxu0 (!%p114_p2), %v1165_v5  ;;  %1170 = vmatprep.subr.bf16.mxu1 (!%p114_p2), %v1165_v5 }
   0xd   : > { %s1504_s17 = smov (!%p136_p3, %s919_s17), 127  ;;  %1168 = vmatpush3.bf16.msra.mxu0 %v1165_v5  ;;  %1172 = vmatpush3.bf16.msra.mxu1 %v1165_v5 }
   0xe   : > { %s920_s20 = sshll.u32 %s1504_s17, 3 }
   0xf   : > { %s1232_s23 = scalar_lea.vmem %s1500_s0, %s920_s20  ;;  %s1367_s26 = scalar_lea.vmem %s1502_s2, %s920_s20 }
  0x10   : > { %v147_v6 = vld [vmem:[%s1232_s23] sm:$0xff]  ;;  %v148_v8 = vld [vmem:[%s1232_s23 + $0x8] sm:$0xff]  ;;  %v149_v10 = vld [vmem:[%s1232_s23 + $0x10] sm:$0xff] }
  0x11   : > { %v179_v7 = vld [vmem:[%s1232_s23 + $0x100] sm:$0xff]  ;;  %v180_v9 = vld [vmem:[%s1232_s23 + $0x108] sm:$0xff]  ;;  %1065 = vmatprep.mubr.msk.f32.mxu0 %vm215_vm0, %v147_v6  ;;  %v181_v11 = vld [vmem:[%s1232_s23 + $0x110] sm:$0xff] }
  0x12   : > { %1113 = vmatprep.mubr.msk.f32.mxu1 %vm215_vm0, %v179_v7  ;;  %1066 = vmatmul.mubr.msk.f32.vlgmr.msra.gmra.mrb[0].mxu0 %vm215_vm0, %v148_v8  ;;  %v150_v12 = vld [vmem:[%s1232_s23 + $0x18] sm:$0xff]  ;;  %v151_v14 = vld [vmem:[%s1232_s23 + $0x20] sm:$0xff]  ;;  %v152_v16 = vld [vmem:[%s1232_s23 + $0x28] sm:$0xff] }
  0x13   : > { %1114 = vmatmul.mubr.msk.f32.vlgmr.msra.gmra.mrb[0].mxu1 %vm215_vm0, %v180_v9  ;;  %1068 = vmatprep.mubr.msk.f32.mxu0 %vm215_vm0, %v149_v10  ;;  %v182_v13 = vld [vmem:[%s1232_s23 + $0x118] sm:$0xff]  ;;  %v183_v15 = vld [vmem:[%s1232_s23 + $0x120] sm:$0xff]  ;;  %v184_v17 = vld [vmem:[%s1232_s23 + $0x128] sm:$0xff] }
  0x14   : > { %1116 = vmatprep.mubr.msk.f32.mxu1 %vm215_vm0, %v181_v11  ;;  %v153_v18 = vld [vmem:[%s1232_s23 + $0x30] sm:$0xff]  ;;  %v154_v20 = vld [vmem:[%s1232_s23 + $0x38] sm:$0xff]  ;;  %v155_v22 = vld [vmem:[%s1232_s23 + $0x40] sm:$0xff] }
  0x15   : > { %v185_v19 = vld [vmem:[%s1232_s23 + $0x130] sm:$0xff]  ;;  %v186_v21 = vld [vmem:[%s1232_s23 + $0x138] sm:$0xff]  ;;  %v187_v23 = vld [vmem:[%s1232_s23 + $0x140] sm:$0xff] }
  0x16   : > { %1069 = vmatmul.mubr.msk.f32.gmra.mrb[2].mxu0 %vm215_vm0, %v150_v12  ;;  %v156_v24 = vld [vmem:[%s1232_s23 + $0x48] sm:$0xff]  ;;  %v157_v26 = vld [vmem:[%s1232_s23 + $0x50] sm:$0xff]  ;;  %v158_v28 = vld [vmem:[%s1232_s23 + $0x58] sm:$0xff] }
  0x17   : > { %1117 = vmatmul.mubr.msk.f32.gmra.mrb[2].mxu1 %vm215_vm0, %v182_v13  ;;  %1071 = vmatprep.mubr.msk.f32.mxu0 %vm215_vm0, %v151_v14  ;;  %v188_v25 = vld [vmem:[%s1232_s23 + $0x148] sm:$0xff]  ;;  %v189_v27 = vld [vmem:[%s1232_s23 + $0x150] sm:$0xff]  ;;  %v190_v29 = vld [vmem:[%s1232_s23 + $0x158] sm:$0xff] }
  0x18   : > { %1119 = vmatprep.mubr.msk.f32.mxu1 %vm215_vm0, %v183_v15  ;;  %v159_v30 = vld [vmem:[%s1232_s23 + $0x60] sm:$0xff]  ;;  %v160_v32 = vld [vmem:[%s1232_s23 + $0x68] sm:$0xff]  ;;  %v161_v34 = vld [vmem:[%s1232_s23 + $0x70] sm:$0xff] }
  0x19   : > { %v191_v31 = vld [vmem:[%s1232_s23 + $0x160] sm:$0xff]  ;;  %v192_v33 = vld [vmem:[%s1232_s23 + $0x168] sm:$0xff]  ;;  %v193_v35 = vld [vmem:[%s1232_s23 + $0x170] sm:$0xff] }
  0x1a   : > { %1072 = vmatmul.mubr.msk.f32.gmra.mrb[4].mxu0 %vm215_vm0, %v152_v16  ;;  %v162_v36 = vld [vmem:[%s1232_s23 + $0x78] sm:$0xff]  ;;  %v163_v38 = vld [vmem:[%s1232_s23 + $0x80] sm:$0xff]  ;;  %v164_v40 = vld [vmem:[%s1232_s23 + $0x88] sm:$0xff] }
  0x1b   : > { %1120 = vmatmul.mubr.msk.f32.gmra.mrb[4].mxu1 %vm215_vm0, %v184_v17  ;;  %1074 = vmatprep.mubr.msk.f32.mxu0 %vm215_vm0, %v153_v18  ;;  %v194_v37 = vld [vmem:[%s1232_s23 + $0x178] sm:$0xff]  ;;  %v195_v39 = vld [vmem:[%s1232_s23 + $0x180] sm:$0xff]  ;;  %v196_v41 = vld [vmem:[%s1232_s23 + $0x188] sm:$0xff] }
  0x1c   : > { %1122 = vmatprep.mubr.msk.f32.mxu1 %vm215_vm0, %v185_v19  ;;  %v165_v42 = vld [vmem:[%s1232_s23 + $0x90] sm:$0xff]  ;;  %v166_v44 = vld [vmem:[%s1232_s23 + $0x98] sm:$0xff]  ;;  %v167_v46 = vld [vmem:[%s1232_s23 + $0xa0] sm:$0xff] }
  0x1d   : > { %v197_v43 = vld [vmem:[%s1232_s23 + $0x190] sm:$0xff]  ;;  %v198_v45 = vld [vmem:[%s1232_s23 + $0x198] sm:$0xff]  ;;  %v199_v47 = vld [vmem:[%s1232_s23 + $0x1a0] sm:$0xff] }
  0x1e   : > { %1075 = vmatmul.mubr.msk.f32.gmra.mrb[6].mxu0 %vm215_vm0, %v154_v20  ;;  %v168_v48 = vld [vmem:[%s1232_s23 + $0xa8] sm:$0xff]  ;;  %v169_v50 = vld [vmem:[%s1232_s23 + $0xb0] sm:$0xff]  ;;  %v170_v52 = vld [vmem:[%s1232_s23 + $0xb8] sm:$0xff] }
  0x1f   : > { %1123 = vmatmul.mubr.msk.f32.gmra.mrb[6].mxu1 %vm215_vm0, %v186_v21  ;;  %1077 = vmatprep.mubr.msk.f32.mxu0 %vm215_vm0, %v155_v22  ;;  %v200_v49 = vld [vmem:[%s1232_s23 + $0x1a8] sm:$0xff]  ;;  %v201_v51 = vld [vmem:[%s1232_s23 + $0x1b0] sm:$0xff]  ;;  %v202_v53 = vld [vmem:[%s1232_s23 + $0x1b8] sm:$0xff] }
  0x20   : > { %1125 = vmatprep.mubr.msk.f32.mxu1 %vm215_vm0, %v187_v23  ;;  %v171_v54 = vld [vmem:[%s1232_s23 + $0xc0] sm:$0xff]  ;;  %v172_v56 = vld [vmem:[%s1232_s23 + $0xc8] sm:$0xff]  ;;  %v173_v58 = vld [vmem:[%s1232_s23 + $0xd0] sm:$0xff] }
  0x21   : > { %v203_v55 = vld [vmem:[%s1232_s23 + $0x1c0] sm:$0xff]  ;;  %v204_v57 = vld [vmem:[%s1232_s23 + $0x1c8] sm:$0xff]  ;;  %v205_v59 = vld [vmem:[%s1232_s23 + $0x1d0] sm:$0xff] }
  0x22   : > { %1078 = vmatmul.mubr.msk.f32.gmra.mrb[8].mxu0 %vm215_vm0, %v156_v24  ;;  %v174_v60 = vld [vmem:[%s1232_s23 + $0xd8] sm:$0xff]  ;;  %v175_v62 = vld [vmem:[%s1232_s23 + $0xe0] sm:$0xff]  ;;  %v176_v0 = vld [vmem:[%s1232_s23 + $0xe8] sm:$0xff] }
  0x23   : > { %1126 = vmatmul.mubr.msk.f32.gmra.mrb[8].mxu1 %vm215_vm0, %v188_v25  ;;  %1080 = vmatprep.mubr.msk.f32.mxu0 %vm215_vm0, %v157_v26  ;;  %v206_v61 = vld [vmem:[%s1232_s23 + $0x1d8] sm:$0xff]  ;;  %v207_v63 = vld [vmem:[%s1232_s23 + $0x1e0] sm:$0xff]  ;;  %v208_v1 = vld [vmem:[%s1232_s23 + $0x1e8] sm:$0xff] }
  0x24   : > { %1128 = vmatprep.mubr.msk.f32.mxu1 %vm215_vm0, %v189_v27  ;;  %v177_v2 = vld [vmem:[%s1232_s23 + $0xf0] sm:$0xff]  ;;  %v178_v4 = vld [vmem:[%s1232_s23 + $0xf8] sm:$0xff] }
  0x25   : > { %v209_v3 = vld [vmem:[%s1232_s23 + $0x1f0] sm:$0xff]  ;;  %v210_v5 = vld [vmem:[%s1232_s23 + $0x1f8] sm:$0xff] }
  0x26   : > { %1081 = vmatmul.mubr.msk.f32.gmra.mrb[10].mxu0 %vm215_vm0, %v158_v28 }
  0x27   : > { %1129 = vmatmul.mubr.msk.f32.gmra.mrb[10].mxu1 %vm215_vm0, %v190_v29  ;;  %1083 = vmatprep.mubr.msk.f32.mxu0 %vm215_vm0, %v159_v30 }
  0x28   : > { %1131 = vmatprep.mubr.msk.f32.mxu1 %vm215_vm0, %v191_v31 }
  0x2a   : > { %1084 = vmatmul.mubr.msk.f32.gmra.mrb[12].mxu0 %vm215_vm0, %v160_v32 }
  0x2b   : > { %1132 = vmatmul.mubr.msk.f32.gmra.mrb[12].mxu1 %vm215_vm0, %v192_v33  ;;  %1086 = vmatprep.mubr.msk.f32.mxu0 %vm215_vm0, %v161_v34 }
  0x2c   : > { %1134 = vmatprep.mubr.msk.f32.mxu1 %vm215_vm0, %v193_v35 }
  0x2e   : > { %1087 = vmatmul.mubr.msk.f32.gmra.mrb[14].mxu0 %vm215_vm0, %v162_v36 }
  0x2f   : > { %1135 = vmatmul.mubr.msk.f32.gmra.mrb[14].mxu1 %vm215_vm0, %v194_v37  ;;  %1089 = vmatprep.mubr.msk.f32.mxu0 %vm215_vm0, %v163_v38 }
  0x30   : > { %1137 = vmatprep.mubr.msk.f32.mxu1 %vm215_vm0, %v195_v39 }
  0x32   : > { %1090 = vmatmul.mubr.msk.f32.gmra.mrb[16].mxu0 %vm215_vm0, %v164_v40 }
  0x33   : > { %1138 = vmatmul.mubr.msk.f32.gmra.mrb[16].mxu1 %vm215_vm0, %v196_v41  ;;  %1092 = vmatprep.mubr.msk.f32.mxu0 %vm215_vm0, %v165_v42 }
  0x34   : > { %1140 = vmatprep.mubr.msk.f32.mxu1 %vm215_vm0, %v197_v43 }
  0x36   : > { %1093 = vmatmul.mubr.msk.f32.gmra.mrb[18].mxu0 %vm215_vm0, %v166_v44 }
  0x37   : > { %1141 = vmatmul.mubr.msk.f32.gmra.mrb[18].mxu1 %vm215_vm0, %v198_v45  ;;  %1095 = vmatprep.mubr.msk.f32.mxu0 %vm215_vm0, %v167_v46 }
  0x38   : > { %1143 = vmatprep.mubr.msk.f32.mxu1 %vm215_vm0, %v199_v47 }
  0x3a   : > { %1096 = vmatmul.mubr.msk.f32.gmra.mrb[20].mxu0 %vm215_vm0, %v168_v48 }
  0x3b   : > { %1144 = vmatmul.mubr.msk.f32.gmra.mrb[20].mxu1 %vm215_vm0, %v200_v49  ;;  %1098 = vmatprep.mubr.msk.f32.mxu0 %vm215_vm0, %v169_v50 }
  0x3c   : > { %1146 = vmatprep.mubr.msk.f32.mxu1 %vm215_vm0, %v201_v51 }
  0x3e   : > { %1099 = vmatmul.mubr.msk.f32.gmra.mrb[22].mxu0 %vm215_vm0, %v170_v52 }
  0x3f   : > { %1147 = vmatmul.mubr.msk.f32.gmra.mrb[22].mxu1 %vm215_vm0, %v202_v53  ;;  %1101 = vmatprep.mubr.msk.f32.mxu0 %vm215_vm0, %v171_v54 }
  0x40   : > { %1149 = vmatprep.mubr.msk.f32.mxu1 %vm215_vm0, %v203_v55 }
  0x42   : > { %1102 = vmatmul.mubr.msk.f32.gmra.mrb[24].mxu0 %vm215_vm0, %v172_v56 }
  0x43   : > { %1150 = vmatmul.mubr.msk.f32.gmra.mrb[24].mxu1 %vm215_vm0, %v204_v57  ;;  %1104 = vmatprep.mubr.msk.f32.mxu0 %vm215_vm0, %v173_v58 }
  0x44   : > { %1152 = vmatprep.mubr.msk.f32.mxu1 %vm215_vm0, %v205_v59 }
  0x46   : > { %1105 = vmatmul.mubr.msk.f32.gmra.mrb[26].mxu0 %vm215_vm0, %v174_v60 }
  0x47   : > { %1153 = vmatmul.mubr.msk.f32.gmra.mrb[26].mxu1 %vm215_vm0, %v206_v61  ;;  %1107 = vmatprep.mubr.msk.f32.mxu0 %vm215_vm0, %v175_v62 }
  0x48   : > { %1155 = vmatprep.mubr.msk.f32.mxu1 %vm215_vm0, %v207_v63 }
  0x4a   : > { %1108 = vmatmul.mubr.msk.f32.gmra.mrb[28].mxu0 %vm215_vm0, %v176_v0 }
  0x4b   : > { %1156 = vmatmul.mubr.msk.f32.gmra.mrb[28].mxu1 %vm215_vm0, %v208_v1  ;;  %1110 = vmatprep.mubr.msk.f32.mxu0 %vm215_vm0, %v177_v2 }
  0x4c   : > { %1158 = vmatprep.mubr.msk.f32.mxu1 %vm215_vm0, %v209_v3 }
  0x4e   : > { %1111 = vmatmul.mubr.msk.f32.gmra.mrb[30].mxu0 %vm215_vm0, %v178_v4 }
  0x4f   : > { %1159 = vmatmul.mubr.msk.f32.gmra.mrb[30].mxu1 %vm215_vm0, %v210_v5 }
  0xe5   : > { %v1067_v6 = vpop.f32.mrb[0].mxu0 }
  0xe6   : > { %v1115_v7 = vpop.f32.mrb[0].mxu1  ;;  %795 = vst.msk [vmem:[%s1367_s26 + $0x8] sm:$0xff] %vm793_vm1, %v1067_v6  ;;  %v474_v8 = vpop.f32.mrb[1].mxu0 }
  0xe7   : > { %827 = vst.msk [vmem:[%s1367_s26 + $0x108] sm:$0xff] %vm793_vm1, %v1115_v7  ;;  %v634_v9 = vpop.f32.mrb[1].mxu1  ;;  %794 = vst.msk [vmem:[%s1367_s26] sm:$0xff] %vm793_vm1, %v474_v8 }
  0xe8   : > { %826 = vst.msk [vmem:[%s1367_s26 + $0x100] sm:$0xff] %vm793_vm1, %v634_v9 }
  0xe9   : > { %v1070_v10 = vpop.f32.mrb[2].mxu0 }
  0xea   : > { %v1118_v11 = vpop.f32.mrb[2].mxu1  ;;  %797 = vst.msk [vmem:[%s1367_s26 + $0x18] sm:$0xff] %vm793_vm1, %v1070_v10  ;;  %v484_v12 = vpop.f32.mrb[3].mxu0 }
  0xeb   : > { %829 = vst.msk [vmem:[%s1367_s26 + $0x118] sm:$0xff] %vm793_vm1, %v1118_v11  ;;  %v644_v13 = vpop.f32.mrb[3].mxu1  ;;  %796 = vst.msk [vmem:[%s1367_s26 + $0x10] sm:$0xff] %vm793_vm1, %v484_v12 }
  0xec   : > { %828 = vst.msk [vmem:[%s1367_s26 + $0x110] sm:$0xff] %vm793_vm1, %v644_v13 }
  0xed   : > { %v1073_v14 = vpop.f32.mrb[4].mxu0 }
  0xee   : > { %v1121_v15 = vpop.f32.mrb[4].mxu1  ;;  %799 = vst.msk [vmem:[%s1367_s26 + $0x28] sm:$0xff] %vm793_vm1, %v1073_v14  ;;  %v494_v16 = vpop.f32.mrb[5].mxu0 }
  0xef   : > { %831 = vst.msk [vmem:[%s1367_s26 + $0x128] sm:$0xff] %vm793_vm1, %v1121_v15  ;;  %v654_v17 = vpop.f32.mrb[5].mxu1  ;;  %798 = vst.msk [vmem:[%s1367_s26 + $0x20] sm:$0xff] %vm793_vm1, %v494_v16 }
  0xf0   : > { %830 = vst.msk [vmem:[%s1367_s26 + $0x120] sm:$0xff] %vm793_vm1, %v654_v17 }
  0xf1   : > { %v1076_v18 = vpop.f32.mrb[6].mxu0 }
  0xf2   : > { %v1124_v19 = vpop.f32.mrb[6].mxu1  ;;  %801 = vst.msk [vmem:[%s1367_s26 + $0x38] sm:$0xff] %vm793_vm1, %v1076_v18  ;;  %v504_v20 = vpop.f32.mrb[7].mxu0 }
  0xf3   : > { %833 = vst.msk [vmem:[%s1367_s26 + $0x138] sm:$0xff] %vm793_vm1, %v1124_v19  ;;  %v664_v21 = vpop.f32.mrb[7].mxu1  ;;  %800 = vst.msk [vmem:[%s1367_s26 + $0x30] sm:$0xff] %vm793_vm1, %v504_v20 }
  0xf4   : > { %832 = vst.msk [vmem:[%s1367_s26 + $0x130] sm:$0xff] %vm793_vm1, %v664_v21 }
  0xf5   : > { %v1079_v22 = vpop.f32.mrb[8].mxu0 }
  0xf6   : > { %v1127_v23 = vpop.f32.mrb[8].mxu1  ;;  %803 = vst.msk [vmem:[%s1367_s26 + $0x48] sm:$0xff] %vm793_vm1, %v1079_v22  ;;  %v514_v24 = vpop.f32.mrb[9].mxu0 }
  0xf7   : > { %835 = vst.msk [vmem:[%s1367_s26 + $0x148] sm:$0xff] %vm793_vm1, %v1127_v23  ;;  %v674_v25 = vpop.f32.mrb[9].mxu1  ;;  %802 = vst.msk [vmem:[%s1367_s26 + $0x40] sm:$0xff] %vm793_vm1, %v514_v24 }
  0xf8   : > { %834 = vst.msk [vmem:[%s1367_s26 + $0x140] sm:$0xff] %vm793_vm1, %v674_v25 }
  0xf9   : > { %v1082_v26 = vpop.f32.mrb[10].mxu0 }
  0xfa   : > { %v1130_v27 = vpop.f32.mrb[10].mxu1  ;;  %805 = vst.msk [vmem:[%s1367_s26 + $0x58] sm:$0xff] %vm793_vm1, %v1082_v26  ;;  %v524_v28 = vpop.f32.mrb[11].mxu0 }
  0xfb   : > { %837 = vst.msk [vmem:[%s1367_s26 + $0x158] sm:$0xff] %vm793_vm1, %v1130_v27  ;;  %v684_v29 = vpop.f32.mrb[11].mxu1  ;;  %804 = vst.msk [vmem:[%s1367_s26 + $0x50] sm:$0xff] %vm793_vm1, %v524_v28 }
  0xfc   : > { %836 = vst.msk [vmem:[%s1367_s26 + $0x150] sm:$0xff] %vm793_vm1, %v684_v29 }
  0xfd   : > { %v1085_v30 = vpop.f32.mrb[12].mxu0 }
  0xfe   : > { %v1133_v31 = vpop.f32.mrb[12].mxu1  ;;  %807 = vst.msk [vmem:[%s1367_s26 + $0x68] sm:$0xff] %vm793_vm1, %v1085_v30  ;;  %v534_v32 = vpop.f32.mrb[13].mxu0 }
  0xff   : > { %839 = vst.msk [vmem:[%s1367_s26 + $0x168] sm:$0xff] %vm793_vm1, %v1133_v31  ;;  %v694_v33 = vpop.f32.mrb[13].mxu1  ;;  %806 = vst.msk [vmem:[%s1367_s26 + $0x60] sm:$0xff] %vm793_vm1, %v534_v32 }
 0x100   : > { %838 = vst.msk [vmem:[%s1367_s26 + $0x160] sm:$0xff] %vm793_vm1, %v694_v33 }
 0x101   : > { %v1088_v34 = vpop.f32.mrb[14].mxu0 }
 0x102   : > { %v1136_v35 = vpop.f32.mrb[14].mxu1  ;;  %809 = vst.msk [vmem:[%s1367_s26 + $0x78] sm:$0xff] %vm793_vm1, %v1088_v34  ;;  %v544_v36 = vpop.f32.mrb[15].mxu0 }
 0x103   : > { %841 = vst.msk [vmem:[%s1367_s26 + $0x178] sm:$0xff] %vm793_vm1, %v1136_v35  ;;  %v704_v37 = vpop.f32.mrb[15].mxu1  ;;  %808 = vst.msk [vmem:[%s1367_s26 + $0x70] sm:$0xff] %vm793_vm1, %v544_v36 }
 0x104   : > { %840 = vst.msk [vmem:[%s1367_s26 + $0x170] sm:$0xff] %vm793_vm1, %v704_v37 }
 0x105   : > { %v1091_v38 = vpop.f32.mrb[16].mxu0 }
 0x106   : > { %v1139_v39 = vpop.f32.mrb[16].mxu1  ;;  %811 = vst.msk [vmem:[%s1367_s26 + $0x88] sm:$0xff] %vm793_vm1, %v1091_v38  ;;  %v554_v40 = vpop.f32.mrb[17].mxu0 }
 0x107   : > { %843 = vst.msk [vmem:[%s1367_s26 + $0x188] sm:$0xff] %vm793_vm1, %v1139_v39  ;;  %v714_v41 = vpop.f32.mrb[17].mxu1  ;;  %810 = vst.msk [vmem:[%s1367_s26 + $0x80] sm:$0xff] %vm793_vm1, %v554_v40 }
 0x108   : > { %842 = vst.msk [vmem:[%s1367_s26 + $0x180] sm:$0xff] %vm793_vm1, %v714_v41 }
 0x109   : > { %v1094_v42 = vpop.f32.mrb[18].mxu0 }
 0x10a   : > { %v1142_v43 = vpop.f32.mrb[18].mxu1  ;;  %813 = vst.msk [vmem:[%s1367_s26 + $0x98] sm:$0xff] %vm793_vm1, %v1094_v42  ;;  %v564_v44 = vpop.f32.mrb[19].mxu0 }
 0x10b   : > { %845 = vst.msk [vmem:[%s1367_s26 + $0x198] sm:$0xff] %vm793_vm1, %v1142_v43  ;;  %v724_v45 = vpop.f32.mrb[19].mxu1  ;;  %812 = vst.msk [vmem:[%s1367_s26 + $0x90] sm:$0xff] %vm793_vm1, %v564_v44 }
 0x10c   : > { %844 = vst.msk [vmem:[%s1367_s26 + $0x190] sm:$0xff] %vm793_vm1, %v724_v45 }
 0x10d   : > { %v1097_v46 = vpop.f32.mrb[20].mxu0 }
 0x10e   : > { %v1145_v47 = vpop.f32.mrb[20].mxu1  ;;  %815 = vst.msk [vmem:[%s1367_s26 + $0xa8] sm:$0xff] %vm793_vm1, %v1097_v46  ;;  %v574_v48 = vpop.f32.mrb[21].mxu0 }
 0x10f   : > { %847 = vst.msk [vmem:[%s1367_s26 + $0x1a8] sm:$0xff] %vm793_vm1, %v1145_v47  ;;  %v734_v49 = vpop.f32.mrb[21].mxu1  ;;  %814 = vst.msk [vmem:[%s1367_s26 + $0xa0] sm:$0xff] %vm793_vm1, %v574_v48 }
 0x110   : > { %846 = vst.msk [vmem:[%s1367_s26 + $0x1a0] sm:$0xff] %vm793_vm1, %v734_v49 }
 0x111   : > { %v1100_v50 = vpop.f32.mrb[22].mxu0 }
 0x112   : > { %v1148_v51 = vpop.f32.mrb[22].mxu1  ;;  %817 = vst.msk [vmem:[%s1367_s26 + $0xb8] sm:$0xff] %vm793_vm1, %v1100_v50  ;;  %v584_v52 = vpop.f32.mrb[23].mxu0 }
 0x113   : > { %849 = vst.msk [vmem:[%s1367_s26 + $0x1b8] sm:$0xff] %vm793_vm1, %v1148_v51  ;;  %v744_v53 = vpop.f32.mrb[23].mxu1  ;;  %816 = vst.msk [vmem:[%s1367_s26 + $0xb0] sm:$0xff] %vm793_vm1, %v584_v52 }
 0x114   : > { %848 = vst.msk [vmem:[%s1367_s26 + $0x1b0] sm:$0xff] %vm793_vm1, %v744_v53 }
 0x115   : > { %v1103_v54 = vpop.f32.mrb[24].mxu0 }
 0x116   : > { %v1151_v55 = vpop.f32.mrb[24].mxu1  ;;  %819 = vst.msk [vmem:[%s1367_s26 + $0xc8] sm:$0xff] %vm793_vm1, %v1103_v54  ;;  %v594_v56 = vpop.f32.mrb[25].mxu0 }
 0x117   : > { %851 = vst.msk [vmem:[%s1367_s26 + $0x1c8] sm:$0xff] %vm793_vm1, %v1151_v55  ;;  %v754_v57 = vpop.f32.mrb[25].mxu1  ;;  %818 = vst.msk [vmem:[%s1367_s26 + $0xc0] sm:$0xff] %vm793_vm1, %v594_v56 }
 0x118   : > { %850 = vst.msk [vmem:[%s1367_s26 + $0x1c0] sm:$0xff] %vm793_vm1, %v754_v57 }
 0x119   : > { %v1106_v58 = vpop.f32.mrb[26].mxu0 }
 0x11a   : > { %v1154_v59 = vpop.f32.mrb[26].mxu1  ;;  %821 = vst.msk [vmem:[%s1367_s26 + $0xd8] sm:$0xff] %vm793_vm1, %v1106_v58  ;;  %v604_v60 = vpop.f32.mrb[27].mxu0 }
 0x11b   : > { %853 = vst.msk [vmem:[%s1367_s26 + $0x1d8] sm:$0xff] %vm793_vm1, %v1154_v59  ;;  %v764_v61 = vpop.f32.mrb[27].mxu1  ;;  %820 = vst.msk [vmem:[%s1367_s26 + $0xd0] sm:$0xff] %vm793_vm1, %v604_v60 }
 0x11c   : > { %852 = vst.msk [vmem:[%s1367_s26 + $0x1d0] sm:$0xff] %vm793_vm1, %v764_v61 }
 0x11d   : > { %v1109_v62 = vpop.f32.mrb[28].mxu0 }
 0x11e   : > { %v1157_v63 = vpop.f32.mrb[28].mxu1  ;;  %823 = vst.msk [vmem:[%s1367_s26 + $0xe8] sm:$0xff] %vm793_vm1, %v1109_v62  ;;  %v614_v0 = vpop.f32.mrb[29].mxu0 }
 0x11f   : > { %855 = vst.msk [vmem:[%s1367_s26 + $0x1e8] sm:$0xff] %vm793_vm1, %v1157_v63  ;;  %v774_v1 = vpop.f32.mrb[29].mxu1  ;;  %822 = vst.msk [vmem:[%s1367_s26 + $0xe0] sm:$0xff] %vm793_vm1, %v614_v0 }
 0x120   : > { %854 = vst.msk [vmem:[%s1367_s26 + $0x1e0] sm:$0xff] %vm793_vm1, %v774_v1 }
 0x121   : > { %v1112_v2 = vpop.f32.mrb[30].mxu0 }
 0x122   : > { %v1160_v3 = vpop.f32.mrb[30].mxu1  ;;  %825 = vst.msk [vmem:[%s1367_s26 + $0xf8] sm:$0xff] %vm793_vm1, %v1112_v2  ;;  %v624_v4 = vpop.f32.mrb[31].mxu0 }
 0x123   : > { %857 = vst.msk [vmem:[%s1367_s26 + $0x1f8] sm:$0xff] %vm793_vm1, %v1160_v3  ;;  %v784_v5 = vpop.f32.mrb[31].mxu1  ;;  %824 = vst.msk [vmem:[%s1367_s26 + $0xf0] sm:$0xff] %vm793_vm1, %v624_v4 }
 0x124   : > { %856 = vst.msk [vmem:[%s1367_s26 + $0x1f0] sm:$0xff] %vm793_vm1, %v784_v5 }
 0x125 PF: > { %s12_s9 = sadd.s32 1, %s1187_s9  }
 0x126   : > { %p9_p4 = scmp.ge.s32.totalorder %s12_s9, 4  }
 0x128   :  { %11 = sbr.rel (!%p9_p4) target bundleno = 1 (0x1), region = 58 }

</bundles_post_ra>
